<compile_context>
chip_gen: v7x
topology: tpu7x:2x2x1
jax: 0.10.0
libtpu: 0.0.40
codegen_flags: <defaults>
</compile_context>

<pallas_src>
import functools

import jax
import jax.numpy as jnp
from jax.experimental import pallas as pl
from jax.experimental.pallas import tpu as pltpu

# Sobel kernels (same values as the PyTorch buffers kx, ky).
KX = ((-1.0, 0.0, 1.0),
      (-2.0, 0.0, 2.0),
      (-1.0, 0.0, 1.0))
KY = ((-1.0, -2.0, -1.0),
      ( 0.0,  0.0,  0.0),
      ( 1.0,  2.0,  1.0))

_TARGET_BLOCK_BYTES = 2 * 1024 * 1024   # ~2 MiB of input per grid step
_OUT_SUBLANES = 8
_OUT_LANES = 128


def _edge_loss_kernel(sr_ref, hr_ref, out_ref, *, use_roll: bool):
    # sr_ref / hr_ref: (Bt, 1, H, W) VMEM blocks (native dtype).
    # out_ref:         (1, 8, 128) f32 per-block partial sum (scalar broadcast).

    # Conv linearity: work on the difference only, cast after the VMEM load.
    d = sr_ref[:, 0].astype(jnp.float32) - hr_ref[:, 0].astype(jnp.float32)
    bt, h, w = d.shape

    # In-kernel zero padding of the rows (1 row each side) -> (Bt, H+2, W).
    zrow = jnp.zeros((bt, 1, w), jnp.float32)
    dp = jnp.concatenate([zrow, d, zrow], axis=1)

    # Column (lane-axis) +-1 shifts with zero fill.
    if use_roll:
        # Lane-aligned W: XLU lane rotate (idle unit here) + boundary mask.
        # pltpu.roll matches jnp.roll: out[..., j] = in[..., j - shift].
        col = jax.lax.broadcasted_iota(jnp.int32, (h + 2, w), 1)
        dl = jnp.where(col == 0,     0.0, pltpu.roll(dp, shift=1,  axis=2))
        dr = jnp.where(col == w - 1, 0.0, pltpu.roll(dp, shift=-1, axis=2))
    else:
        # Arbitrary W (e.g. the 16x16 demo): zero column + static slices.
        zcol = jnp.zeros((bt, h + 2, 1), jnp.float32)
        dl = jnp.concatenate([zcol, dp[:, :, : w - 1]], axis=2)   # d[..., j-1]
        dr = jnp.concatenate([dp[:, :, 1:], zcol], axis=2)        # d[..., j+1]

    # Separable Sobel, horizontal passes.
    a = dr - dl                     # [-1, 0, 1] along columns
    b = dl + dr + 2.0 * dp          # [ 1, 2, 1] along columns

    # Vertical passes: cheap sublane slices of the row-padded intermediates.
    gx = a[:, 0:h, :] + 2.0 * a[:, 1:h + 1, :] + a[:, 2:h + 2, :]   # [1, 2, 1]
    gy = b[:, 2:h + 2, :] - b[:, 0:h, :]                            # [-1, 0, 1]

    partial = jnp.sum(jnp.abs(gx)) + jnp.sum(jnp.abs(gy))
    out_ref[...] = jnp.full((1, _OUT_SUBLANES, _OUT_LANES), partial, jnp.float32)


def edge_loss(sr: jax.Array, hr: jax.Array, *, block_batch=None) -> jax.Array:
    """EdgeLoss.forward: mean|Gx(sr)-Gx(hr)| + mean|Gy(sr)-Gy(hr)|.

    sr, hr: (N, 1, H, W) float arrays (NCHW, single channel). Returns f32 scalar.
    """
    assert sr.shape == hr.shape and sr.ndim == 4 and sr.shape[1] == 1
    n, _, h, w = sr.shape

    if block_batch is None:
        # Batch several images per grid step so each step moves O(MiB) per
        # input rather than one tiny image; stays well inside v7x's 64 MiB VMEM
        # even with double-buffered inputs + f32 intermediates.
        itemsize = jnp.dtype(sr.dtype).itemsize
        cap = max(1, _TARGET_BLOCK_BYTES // (h * w * itemsize))
        block_batch = 1
        for cand in range(1, min(n, cap) + 1):
            if n % cand == 0:
                block_batch = cand
    assert n % block_batch == 0
    num_blocks = n // block_batch
    # TODO(synk): row-tile (with a 1-row halo) inside a batch block for very
    # large single images whose full (H, W) plane exceeds the VMEM budget.

    in_spec = pl.BlockSpec((block_batch, 1, h, w), lambda b: (b, 0, 0, 0))
    out_spec = pl.BlockSpec((1, _OUT_SUBLANES, _OUT_LANES), lambda b: (b, 0, 0))

    kernel = functools.partial(_edge_loss_kernel, use_roll=(w % 128 == 0))

    partials = pl.pallas_call(
        kernel,
        out_shape=jax.ShapeDtypeStruct(
            (num_blocks, _OUT_SUBLANES, _OUT_LANES), jnp.float32),
        grid_spec=pltpu.PrefetchScalarGridSpec(
            num_scalar_prefetch=0,
            grid=(num_blocks,),
            in_specs=[in_spec, in_spec],
            out_specs=out_spec,
        ),
        compiler_params=pltpu.CompilerParams(
            # Independent per-block partials -> batch axis can be split across
            # TensorCores (v7x megacore); no shared accumulator, no race.
            dimension_semantics=("parallel",),
            vmem_limit_bytes=48 * 1024 * 1024,
        ),
    )(sr, hr)

    total = jnp.sum(partials[:, 0, 0])
    return total / jnp.float32(n * h * w)


def _edge_loss_reference(sr: jax.Array, hr: jax.Array) -> jax.Array:
    """Pure-JAX reference mirroring the PyTorch module exactly."""
    kx = jnp.array(KX, jnp.float32)
    ky = jnp.array(KY, jnp.float32)
    n, _, h, w = sr.shape

    def conv(x, k):
        xp = jnp.pad(x[:, 0].astype(jnp.float32), ((0, 0), (1, 1), (1, 1)))
        out = jnp.zeros((n, h, w), jnp.float32)
        for di in range(3):
            for dj in range(3):
                out = out + k[di, dj] * xp[:, di:di + h, dj:dj + w]
        return out

    gx = jnp.abs(conv(sr, kx) - conv(hr, kx))
    gy = jnp.abs(conv(sr, ky) - conv(hr, ky))
    return jnp.mean(gx) + jnp.mean(gy)


if __name__ == "__main__":
    key = jax.random.PRNGKey(0)
    k1, k2 = jax.random.split(key)
    N, C, H, W = 2, 1, 16, 16  # C must be 1 (EdgeLoss kernels are single-channel)
    sr = jax.random.normal(k1, (N, C, H, W), dtype=jnp.float32)
    hr = jax.random.normal(k2, (N, C, H, W), dtype=jnp.float32)

    ref = jax.block_until_ready(_edge_loss_reference(sr, hr))

    # Default blocking: whole batch in one grid step.
    loss = jax.block_until_ready(edge_loss(sr, hr))
    assert jnp.allclose(loss, ref, rtol=1e-4, atol=1e-5), (loss, ref)

    # Multi-block grid (one image per step): exercises the independent
    # per-block partial outputs + "parallel" batch axis.
    loss_mb = jax.block_until_ready(edge_loss(sr, hr, block_batch=1))
    assert jnp.allclose(loss_mb, ref, rtol=1e-4, atol=1e-5), (loss_mb, ref)

    print("KERNEL_OK")
</pallas_src>

<mosaic_0001>
module attributes {stable_mosaic.version = 11 : i64} {
  func.func @_edge_loss_kernel(%arg0: i32, %arg1: memref<2x1x16x16xf32, #tpu.memory_space<vmem>>, %arg2: memref<2x1x16x16xf32, #tpu.memory_space<vmem>>, %arg3: memref<1x8x128xf32, #tpu.memory_space<vmem>>) attributes {dimension_semantics = [#tpu.dimension_semantics<parallel>], iteration_bounds = array<i64: 1>, scalar_prefetch = 0 : i64, scratch_operands = 0 : i64, tpu.core_type = #tpu.core_type<tc>, window_params = [{transform_indices = @transform_0, window_bounds = array<i64: 2, 1, 16, 16>}, {transform_indices = @transform_1, window_bounds = array<i64: 2, 1, 16, 16>}, {transform_indices = @transform_2, window_bounds = array<i64: 1, 8, 128>}]} {
    %c0 = arith.constant 0 : index
    %c0_0 = arith.constant 0 : index
    %c0_1 = arith.constant 0 : index
    %c0_2 = arith.constant 0 : index
    %0 = vector.load %arg1[%c0, %c0_0, %c0_1, %c0_2] : memref<2x1x16x16xf32, #tpu.memory_space<vmem>>, vector<2x1x16x16xf32>
    %1 = vector.shape_cast %0 : vector<2x1x16x16xf32> to vector<2x16x16xf32>
    %c0_3 = arith.constant 0 : index
    %c0_4 = arith.constant 0 : index
    %c0_5 = arith.constant 0 : index
    %c0_6 = arith.constant 0 : index
    %2 = vector.load %arg2[%c0_3, %c0_4, %c0_5, %c0_6] : memref<2x1x16x16xf32, #tpu.memory_space<vmem>>, vector<2x1x16x16xf32>
    %3 = vector.shape_cast %2 : vector<2x1x16x16xf32> to vector<2x16x16xf32>
    %4 = arith.subf %1, %3 : vector<2x16x16xf32>
    %cst = arith.constant 0.000000e+00 : f32
    %5 = vector.broadcast %cst : f32 to vector<2x1x16xf32>
    %6 = tpu.concatenate %5, %4, %5 in 1 : vector<2x1x16xf32>, vector<2x16x16xf32>, vector<2x1x16xf32> -> vector<2x18x16xf32>
    %cst_7 = arith.constant 0.000000e+00 : f32
    %7 = vector.broadcast %cst_7 : f32 to vector<2x18x1xf32>
    %8 = vector.extract_strided_slice %6 {offsets = [0, 0, 0], sizes = [2, 18, 15], strides = [1, 1, 1]} : vector<2x18x16xf32> to vector<2x18x15xf32>
    %9 = tpu.concatenate %7, %8 in 2 : vector<2x18x1xf32>, vector<2x18x15xf32> -> vector<2x18x16xf32>
    %10 = vector.extract_strided_slice %6 {offsets = [0, 0, 1], sizes = [2, 18, 15], strides = [1, 1, 1]} : vector<2x18x16xf32> to vector<2x18x15xf32>
    %11 = tpu.concatenate %10, %7 in 2 : vector<2x18x15xf32>, vector<2x18x1xf32> -> vector<2x18x16xf32>
    %12 = arith.subf %11, %9 : vector<2x18x16xf32>
    %13 = arith.addf %9, %11 : vector<2x18x16xf32>
    %cst_8 = arith.constant 2.000000e+00 : f32
    %14 = vector.broadcast %cst_8 : f32 to vector<2x18x16xf32>
    %15 = arith.mulf %14, %6 : vector<2x18x16xf32>
    %16 = arith.addf %13, %15 : vector<2x18x16xf32>
    %17 = vector.extract_strided_slice %12 {offsets = [0, 0, 0], sizes = [2, 16, 16], strides = [1, 1, 1]} : vector<2x18x16xf32> to vector<2x16x16xf32>
    %18 = vector.extract_strided_slice %12 {offsets = [0, 1, 0], sizes = [2, 16, 16], strides = [1, 1, 1]} : vector<2x18x16xf32> to vector<2x16x16xf32>
    %cst_9 = arith.constant 2.000000e+00 : f32
    %19 = vector.broadcast %cst_9 : f32 to vector<2x16x16xf32>
    %20 = arith.mulf %19, %18 : vector<2x16x16xf32>
    %21 = arith.addf %17, %20 : vector<2x16x16xf32>
    %22 = vector.extract_strided_slice %12 {offsets = [0, 2, 0], sizes = [2, 16, 16], strides = [1, 1, 1]} : vector<2x18x16xf32> to vector<2x16x16xf32>
    %23 = arith.addf %21, %22 : vector<2x16x16xf32>
    %24 = vector.extract_strided_slice %16 {offsets = [0, 2, 0], sizes = [2, 16, 16], strides = [1, 1, 1]} : vector<2x18x16xf32> to vector<2x16x16xf32>
    %25 = vector.extract_strided_slice %16 {offsets = [0, 0, 0], sizes = [2, 16, 16], strides = [1, 1, 1]} : vector<2x18x16xf32> to vector<2x16x16xf32>
    %26 = arith.subf %24, %25 : vector<2x16x16xf32>
    %27 = math.absf %23 : vector<2x16x16xf32>
    %28 = vector.shape_cast %27 : vector<2x16x16xf32> to vector<1x2x16x16xf32>
    %cst_10 = arith.constant dense<0.000000e+00> : vector<1xf32>
    %29 = vector.multi_reduction <add>, %28, %cst_10 [1, 2, 3] : vector<1x2x16x16xf32> to vector<1xf32>
    %30 = vector.shape_cast %29 : vector<1xf32> to vector<1x1x1x1xf32>
    %31 = vector.extract %30[0, 0, 0, 0] : f32 from vector<1x1x1x1xf32>
    %32 = math.absf %26 : vector<2x16x16xf32>
    %33 = vector.shape_cast %32 : vector<2x16x16xf32> to vector<1x2x16x16xf32>
    %cst_11 = arith.constant dense<0.000000e+00> : vector<1xf32>
    %34 = vector.multi_reduction <add>, %33, %cst_11 [1, 2, 3] : vector<1x2x16x16xf32> to vector<1xf32>
    %35 = vector.shape_cast %34 : vector<1xf32> to vector<1x1x1x1xf32>
    %36 = vector.extract %35[0, 0, 0, 0] : f32 from vector<1x1x1x1xf32>
    %37 = arith.addf %31, %36 : f32
    %38 = vector.broadcast %37 : f32 to vector<1x8x128xf32>
    %c0_12 = arith.constant 0 : index
    %c0_13 = arith.constant 0 : index
    %c0_14 = arith.constant 0 : index
    %39 = vector.load %arg3[%c0_12, %c0_13, %c0_14] : memref<1x8x128xf32, #tpu.memory_space<vmem>>, vector<1x8x128xf32>
    tpu.vector_store %arg3[%c0_12, %c0_13, %c0_14], %38 {strides = array<i32>} : memref<1x8x128xf32, #tpu.memory_space<vmem>>, vector<1x8x128xf32>,
    return
  }
  func.func @transform_0(%arg0: i32) -> (i32, i32, i32, i32) {
    %c0_i32 = arith.constant 0 : i32
    %c0_i32_0 = arith.constant 0 : i32
    %c0_i32_1 = arith.constant 0 : i32
    %c0_i32_2 = arith.constant 0 : i32
    return %arg0, %c0_i32, %c0_i32_0, %c0_i32_1 : i32, i32, i32, i32
  }
  func.func @transform_1(%arg0: i32) -> (i32, i32, i32, i32) {
    %c0_i32 = arith.constant 0 : i32
    %c0_i32_0 = arith.constant 0 : i32
    %c0_i32_1 = arith.constant 0 : i32
    %c0_i32_2 = arith.constant 0 : i32
    return %arg0, %c0_i32, %c0_i32_0, %c0_i32_1 : i32, i32, i32, i32
  }
  func.func @transform_2(%arg0: i32) -> (i32, i32, i32) {
    %c0_i32 = arith.constant 0 : i32
    %c0_i32_0 = arith.constant 0 : i32
    %c0_i32_1 = arith.constant 0 : i32
    return %arg0, %c0_i32, %c0_i32_0 : i32, i32, i32
  }
}

</mosaic_0001>

<bundles_post_ra>
// kernel: tpu_custom_call.1
= control target key start
LH: loop header
LB: loop body
LE: loop exit
PB: predicated region body
PF: predicated region fallthrough
CT: control target
= control target key end

     0   :  { %7 = vsyncpa [#allocation3], 0  ;;  %s493_s0 = inlined_call_operand.hbm [shape: f32[2,1,16,16], index: 0, kind: input, shape index: {}]   ;;  %s494_s1 = inlined_call_operand.hbm [shape: f32[2,1,16,16], index: 1, kind: input, shape index: {}]   ;;  %s495_s2 = inlined_call_operand.hbm [shape: f32[1,8,128], index: 2, kind: output, shape index: {}]  }
   0x1   :  { %8 = vsyncpa [#allocation6], 0 }
   0x2   :  { %9 = vsyncpa [#allocation4], 0  ;;  %s395_s9 = smov [#allocation2]   ;;  %s323_s13 = scalar_lea.hbm %s493_s0, 512 }
   0x3   :  { %s15_s10 = sshll.u32 %s395_s9, 4  ;;  %p324_p0 = scmp.ne.s32.totalorder %s493_s0, %s323_s13  ;;  %s16_s10 = int_to_ptr.vmem [resolvable:$true] %s15_s10 }
   0x4   :  { %p327_p1 = scmp.lt.u32.totalorder %s323_s13, %s493_s0 }
   0x6   :  { %p329_p2 = pnand %p327_p1, %p324_p0 }
   0x8   :  { %332 = shalt.err (!%p329_p2)
}
   0x9   :  { %s333_s18 = scalar_lea.vmem %s16_s10, 512  ;;  %p338_p4 = scmp.lt.s32.totalorder %s16_s10, %s16_s10 }
   0xa   :  { %p334_p3 = scmp.ne.s32.totalorder %s16_s10, %s333_s18  ;;  %p339_p5 = scmp.lt.s32.totalorder %s333_s18, %s333_s18 }
   0xc   :  { %p340_p6 = por %p339_p5, %p338_p4 }
   0xe   :  { %p341_p7 = pnand %p340_p6, %p334_p3 }
  0x10   :  { %344 = shalt.err (!%p341_p7)
}
  0x11   :  { %s396_s19 = smov 128   ;;  %s397_s20 = smov 8  }
  0x12   :  { %21 = dma.hbm_to_vmem [thread:$0]  %s493_s0, 512, %s16_s10, [#allocation3], %s396_s19, %s396_s19, %s397_s20  }
  0x13   :  { %s398_s23 = smov [#allocation5]   ;;  %s345_s27 = scalar_lea.hbm %s494_s1, 512 }
  0x14   :  { %s27_s24 = sshll.u32 %s398_s23, 4  ;;  %p346_p8 = scmp.ne.s32.totalorder %s494_s1, %s345_s27  ;;  %s28_s24 = int_to_ptr.vmem [resolvable:$true] %s27_s24 }
  0x15   :  { %p349_p9 = scmp.lt.u32.totalorder %s345_s27, %s494_s1 }
  0x17   :  { %p351_p10 = pnand %p349_p9, %p346_p8 }
  0x19   :  { %354 = shalt.err (!%p351_p10)
}
  0x1a   :  { %s355_s4 = scalar_lea.vmem %s28_s24, 512  ;;  %p360_p12 = scmp.lt.s32.totalorder %s28_s24, %s28_s24 }
  0x1b   :  { %p356_p11 = scmp.ne.s32.totalorder %s28_s24, %s355_s4  ;;  %p361_p13 = scmp.lt.s32.totalorder %s355_s4, %s355_s4 }
  0x1d   :  { %p362_p0 = por %p361_p13, %p360_p12 }
  0x1f   :  { %p363_p1 = pnand %p362_p0, %p356_p11 }
  0x21   :  { %366 = shalt.err (!%p363_p1)
}
  0x22   :  { %33 = dma.hbm_to_vmem [thread:$0]  %s494_s1, 512, %s28_s24, [#allocation6], %s396_s19, %s396_s19, %s397_s20  }
  0x23   :  { %389 = dma.done.wait [#allocation3], 512  }
  0x24   :  { %390 = vsyncadd [#allocation3], 4294966784 }
  0x25   :  { %391 = dma.done.wait [#allocation6], 512  }
  0x26   :  { %392 = vsyncadd [#allocation6], 4294966784  ;;  %v40_v0 = vld [vmem:[#allocation2] sm:$0xff]  ;;  %v41_v2 = vld [vmem:[#allocation2 + $0x8] sm:$0xff]  ;;  %vm56_vm0 = vcmask 1040384   ;;  %s399_s1 = smov 127  }
  0x27   :  { %v44_v1 = vld [vmem:[#allocation5] sm:$0xff]  ;;  %v45_v4 = vld [vmem:[#allocation5 + $0x8] sm:$0xff]  ;;  %v42_v7 = vld [vmem:[#allocation2 + $0x10] sm:$0xff]  ;;  %s400_s6 = smov 1   ;;  %vm120_vm1 = vcmask 121856   ;;  %vm95_vm2 = vcmask 7168  }
  0x28   :  { %v48_v3 = vsub.f32 %v40_v0, %v44_v1  ;;  %v49_v5 = vsub.f32 %v41_v2, %v45_v4  ;;  %v43_v9 = vld [vmem:[#allocation2 + $0x18] sm:$0xff]  ;;  %v46_v10 = vld [vmem:[#allocation5 + $0x10] sm:$0xff]  ;;  %vm188_vm3 = vcmask 1045504   ;;  %vm211_vm4 = vcmask 1041408   ;;  %s401_s8 = smov [#allocation7]  }
  0x29   :  { %v47_v11 = vld [vmem:[#allocation5 + $0x18] sm:$0xff]  ;;  %v50_v14 = vsub.f32 %v42_v7, %v46_v10  ;;  %vm163_vm5 = vcmask 1046528   ;;  %vm234_vm6 = vcmask 130048   ;;  %s302_s9 = sshll.u32 %s401_s8, 4  ;;  %s303_s9 = int_to_ptr.vmem [resolvable:$true] %s302_s9 }
  0x2a   :  { %v57_v6 = vrot.slane %v48_v3, 7  ;;  %v58_v8 = vrot.slane %v49_v5, 7  ;;  %v51_v15 = vsub.f32 %v43_v9, %v47_v11  ;;  %s367_s12 = scalar_lea.vmem %s303_s9, 128  ;;  %p372_p3 = scmp.lt.s32.totalorder %s303_s9, %s303_s9 }
  0x2b   :  { %v60_v17 = vrot.slane %v50_v14, 7  ;;  %p368_p2 = scmp.ne.s32.totalorder %s303_s9, %s367_s12  ;;  %p373_p4 = scmp.lt.s32.totalorder %s367_s12, %s367_s12 }
  0x2c   :  { %v69_v12 = vsel %vm56_vm0, 0.0, %v57_v6  ;;  %v59_v13 = vsel %vm56_vm0, %v57_v6, %v58_v8  ;;  %v71_v16 = vsel %vm56_vm0, %v58_v8, 0.0  ;;  %v61_v18 = vrot.slane %v51_v15, 7 }
  0x2d   :  { %102 = vrot.lane.b32.xlu1 %v69_v12, %s399_s1  ;;  %77 = vrot.lane.b32.xlu0 %v69_v12, %s400_s6  ;;  %v70_v20 = vsel %vm56_vm0, 0.0, %v60_v17  ;;  %v139_v22 = vmul.f32 2.0, %v69_v12  ;;  %v140_v29 = vmul.f32 2.0, %v59_v13  ;;  %v141_v44 = vmul.f32 2.0, %v71_v16  ;;  %p374_p5 = por %p373_p4, %p372_p3 }
  0x2e   :  { %v62_v19 = vsel %vm56_vm0, %v60_v17, %v61_v18  ;;  %v72_v21 = vsel %vm56_vm0, %v61_v18, 0.0  ;;  %v142_v0 = vmul.f32 2.0, %v70_v20 }
  0x2f   :  { %v143_v54 = vmul.f32 2.0, %v62_v19  ;;  %v144_v1 = vmul.f32 2.0, %v72_v21  ;;  %p375_p6 = pnand %p374_p5, %p368_p2 }
  0x31   :  { %104 = vrot.lane.b32.xlu1 %v59_v13, %s399_s1  ;;  %79 = vrot.lane.b32.xlu0 %v59_v13, %s400_s6 }
  0x35   :  { %106 = vrot.lane.b32.xlu1 %v71_v16, %s399_s1  ;;  %81 = vrot.lane.b32.xlu0 %v71_v16, %s400_s6 }
  0x39   :  { %85 = vrot.lane.b32.xlu1 %v62_v19, %s400_s6  ;;  %83 = vrot.lane.b32.xlu0 %v70_v20, %s400_s6 }
  0x3d   :  { %110 = vrot.lane.b32.xlu1 %v62_v19, %s399_s1  ;;  %108 = vrot.lane.b32.xlu0 %v70_v20, %s399_s1 }
  0x41   :  { %112 = vrot.lane.b32.xlu1 %v72_v21, %s399_s1  ;;  %87 = vrot.lane.b32.xlu0 %v72_v21, %s400_s6 }
  0x9f   :  { %v103_v23 = vpop.permute.xlu1 %102  ;;  %v78_v24 = vpop.permute.xlu0 %77 }
  0xa0   :  { %v121_v25 = vsel %vm120_vm1, %v103_v23, 0.0  ;;  %v96_v26 = vsel %vm95_vm2, 0.0, %v78_v24 }
  0xa1   :  { %v133_v27 = vadd.f32 %v121_v25, %v96_v26  ;;  %v127_v28 = vsub.f32 %v121_v25, %v96_v26 }
  0xa3   :  { %v145_v30 = vadd.f32 %v139_v22, %v133_v27  ;;  %v105_v31 = vpop.permute.xlu1 %104  ;;  %v80_v32 = vpop.permute.xlu0 %79  ;;  %v151_v38 = vmul.f32 2.0, %v127_v28  ;;  %v189_v55 = vrot.slane %v127_v28, 2 }
  0xa4   :  { %v122_v33 = vsel %vm120_vm1, %v105_v31, 0.0  ;;  %v97_v34 = vsel %vm95_vm2, 0.0, %v80_v32 }
  0xa5   :  { %v212_v35 = vrot.slane %v145_v30, 6  ;;  %v128_v36 = vsub.f32 %v122_v33, %v97_v34  ;;  %v134_v37 = vadd.f32 %v122_v33, %v97_v34  ;;  %v164_v50 = vrot.slane %v151_v38, 1 }
  0xa7   :  { %v224_v39 = vsub.f32 %v145_v30, %v212_v35  ;;  %v146_v40 = vadd.f32 %v140_v29, %v134_v37  ;;  %v152_v41 = vmul.f32 2.0, %v128_v36  ;;  %v107_v42 = vpop.permute.xlu1 %106  ;;  %v82_v43 = vpop.permute.xlu0 %81  ;;  %v190_v52 = vrot.slane %v128_v36, 2 }
  0xa8   :  { %v123_v45 = vsel %vm120_vm1, %v107_v42, 0.0  ;;  %v98_v46 = vsel %vm95_vm2, 0.0, %v82_v43 }
  0xa9   :  { %v165_v47 = vrot.slane %v152_v41, 1  ;;  %v213_v48 = vrot.slane %v146_v40, 6  ;;  %v129_v49 = vsub.f32 %v123_v45, %v98_v46  ;;  %v251_v51 = vand.u32 2147483647, %v224_v39 }
  0xaa   :  { %v135_v53 = vadd.f32 %v123_v45, %v98_v46  ;;  %v191_v6 = vsel %vm188_vm3, %v189_v55, %v190_v52 }
  0xab   :  { %v214_v56 = vsel %vm211_vm4, %v212_v35, %v213_v48  ;;  %v153_v57 = vmul.f32 2.0, %v129_v49  ;;  %v86_v58 = vpop.permute.xlu1 %85  ;;  %v84_v59 = vpop.permute.xlu0 %83  ;;  %v166_v60 = vsel %vm163_vm5, %v164_v50, %v165_v47  ;;  %v192_v63 = vrot.slane %v129_v49, 2 }
  0xac   :  { %v225_v61 = vsub.f32 %v146_v40, %v214_v56  ;;  %v147_v62 = vadd.f32 %v141_v44, %v135_v53  ;;  %v263_v3 = vrot.slane %v251_v51, 2  ;;  %v100_v8 = vsel %vm95_vm2, 0.0, %v86_v58 }
  0xad   :  { %v167_v2 = vrot.slane %v153_v57, 1  ;;  %v99_v9 = vsel %vm95_vm2, 0.0, %v84_v59  ;;  %v178_v12 = vadd.f32 %v166_v60, %v127_v28  ;;  %v193_v14 = vsel %vm188_vm3, %v190_v52, %v192_v63 }
  0xae   :  { %v252_v4 = vand.u32 2147483647, %v225_v61  ;;  %v226_v5 = vsub.f32 %v147_v62, %v213_v48 }
  0xaf   :  { %v168_v7 = vsel %vm163_vm5, %v165_v47, %v167_v2  ;;  %v111_v10 = vpop.permute.xlu1 %110  ;;  %v109_v11 = vpop.permute.xlu0 %108  ;;  %v203_v45 = vadd.f32 %v191_v6, %v178_v12 }
  0xb0   :  { %v264_v13 = vrot.slane %v252_v4, 2  ;;  %v253_v15 = vand.u32 2147483647, %v226_v5  ;;  %v125_v16 = vsel %vm120_vm1, %v111_v10, 0.0  ;;  %v179_v17 = vadd.f32 %v168_v7, %v128_v36 }
  0xb1   :  { %v131_v18 = vsub.f32 %v125_v16, %v100_v8  ;;  %v137_v19 = vadd.f32 %v125_v16, %v100_v8  ;;  %v124_v20 = vsel %vm120_vm1, %v109_v11, 0.0  ;;  %v230_v60 = vand.u32 2147483647, %v203_v45 }
  0xb2   :  { %v266_v21 = vrot.slane %v253_v15, 2  ;;  %v130_v22 = vsub.f32 %v124_v20, %v99_v9  ;;  %v136_v23 = vadd.f32 %v124_v20, %v99_v9  ;;  %v265_v24 = vsel %vm188_vm3, %v263_v3, %v264_v13 }
  0xb3   :  { %v149_v25 = vadd.f32 %v143_v54, %v137_v19  ;;  %v155_v26 = vmul.f32 2.0, %v131_v18  ;;  %v195_v27 = vrot.slane %v131_v18, 2  ;;  %v113_v28 = vpop.permute.xlu1 %112  ;;  %v88_v29 = vpop.permute.xlu0 %87  ;;  %v277_v30 = vsel %vm234_vm6, %v265_v24, 0.0 }
  0xb4   :  { %v148_v31 = vadd.f32 %v142_v0, %v136_v23  ;;  %v154_v32 = vmul.f32 2.0, %v130_v22  ;;  %v194_v33 = vrot.slane %v130_v22, 2  ;;  %v126_v34 = vsel %vm120_vm1, %v113_v28, 0.0 }
  0xb5   :  { %v170_v35 = vrot.slane %v155_v26, 1  ;;  %v216_v36 = vrot.slane %v149_v25, 6  ;;  %v101_v37 = vsel %vm95_vm2, 0.0, %v88_v29  ;;  %v267_v38 = vsel %vm188_vm3, %v264_v13, %v266_v21 }
  0xb6   :  { %v169_v39 = vrot.slane %v154_v32, 1  ;;  %v215_v40 = vrot.slane %v148_v31, 6  ;;  %v132_v41 = vsub.f32 %v126_v34, %v101_v37  ;;  %v138_v42 = vadd.f32 %v126_v34, %v101_v37 }
  0xb7   :  { %v278_v43 = vsel %vm234_vm6, %v267_v38, 0.0  ;;  %v196_v44 = vsel %vm188_vm3, %v194_v33, %v195_v27  ;;  %v204_v46 = vadd.f32 %v193_v14, %v179_v17  ;;  %v235_v9 = vsel %vm234_vm6, %v230_v60, 0.0 }
  0xb8   :  { %v171_v47 = vsel %vm163_vm5, %v169_v39, %v170_v35  ;;  %v227_v48 = vsub.f32 %v148_v31, %v215_v40  ;;  %v150_v49 = vadd.f32 %v144_v1, %v138_v42  ;;  %v156_v50 = vmul.f32 2.0, %v132_v41 }
  0xb9   :  { %v180_v51 = vadd.f32 %v171_v47, %v130_v22  ;;  %v197_v52 = vrot.slane %v132_v41, 2  ;;  %v217_v53 = vsel %vm211_vm4, %v215_v40, %v216_v36  ;;  %v279_v54 = vadd.f32 %v278_v43, %v277_v30 }
  0xba   :  { %v254_v55 = vand.u32 2147483647, %v227_v48  ;;  %v172_v56 = vrot.slane %v156_v50, 1  ;;  %v229_v57 = vsub.f32 %v150_v49, %v216_v36  ;;  %v228_v58 = vsub.f32 %v149_v25, %v217_v53 }
  0xbb   :  { %v205_v59 = vadd.f32 %v196_v44, %v180_v51  ;;  %v231_v61 = vand.u32 2147483647, %v204_v46  ;;  %v198_v7 = vsel %vm188_vm3, %v195_v27, %v197_v52 }
  0xbc   :  { %v268_v62 = vrot.slane %v254_v55, 2  ;;  %v256_v63 = vand.u32 2147483647, %v229_v57  ;;  %v255_v0 = vand.u32 2147483647, %v228_v58  ;;  %v173_v2 = vsel %vm163_vm5, %v170_v35, %v172_v56 }
  0xbd   :  { %v181_v3 = vadd.f32 %v173_v2, %v131_v18  ;;  %v232_v1 = vand.u32 2147483647, %v205_v59  ;;  %v236_v4 = vsel %vm234_vm6, %v231_v61, 0.0 }
  0xbe   :  { %v271_v5 = vrot.slane %v256_v63, 2  ;;  %v269_v6 = vrot.slane %v255_v0, 2  ;;  %v237_v13 = vadd.f32 %v236_v4, %v235_v9 }
  0xbf   :  { %v206_v8 = vadd.f32 %v198_v7, %v181_v3  ;;  %v238_v10 = vsel %vm234_vm6, %v232_v1, 0.0 }
  0xc0   :  { %v270_v11 = vsel %vm188_vm3, %v268_v62, %v269_v6  ;;  %v272_v12 = vsel %vm188_vm3, %v269_v6, %v271_v5  ;;  %v239_v18 = vadd.f32 %v238_v10, %v237_v13 }
  0xc1   :  { %v280_v14 = vsel %vm234_vm6, %v270_v11, 0.0  ;;  %v282_v15 = vsel %vm234_vm6, %v272_v12, 0.0  ;;  %v233_v16 = vand.u32 2147483647, %v206_v8 }
  0xc2   :  { %v281_v17 = vadd.f32 %v280_v14, %v279_v54 }
  0xc3   :  { %v240_v19 = vsel %vm234_vm6, %v233_v16, 0.0 }
  0xc4   :  { %v283_v20 = vadd.f32 %v282_v15, %v281_v17  ;;  %v241_v21 = vadd.f32 %v240_v19, %v239_v18 }
  0xc6   :  { %284 = vadd.xlane.f32.xlu1 %v283_v20  ;;  %242 = vadd.xlane.f32.xlu0 %v241_v21 }
 0x153   :  { %v285_v22 = vpop.xlane.xlu1 %284  ;;  %v243_v23 = vpop.xlane.xlu0 %242 }
 0x154   :  { %v286_v24 = vrot.slane %v285_v22, 4  ;;  %v244_v25 = vrot.slane %v243_v23, 4 }
 0x156   :  { %v287_v26 = vadd.f32 %v286_v24, %v285_v22  ;;  %v245_v27 = vadd.f32 %v244_v25, %v243_v23 }
 0x158   :  { %v288_v28 = vrot.slane %v287_v26, 2  ;;  %v246_v29 = vrot.slane %v245_v27, 2 }
 0x15a   :  { %v289_v30 = vadd.f32 %v288_v28, %v287_v26  ;;  %v247_v31 = vadd.f32 %v246_v29, %v245_v27 }
 0x15c   :  { %v248_v32 = vrot.slane %v247_v31, 1  ;;  %v290_v33 = vrot.slane %v289_v30, 1 }
 0x15e   :  { %v249_v34 = vadd.f32 %v248_v32, %v247_v31  ;;  %v291_v35 = vadd.f32 %v290_v33, %v289_v30 }
 0x160   :  { %312 = vpush %v249_v34 }
 0x161   :  { %314 = vpush %v291_v35 }
 0x191   :  { %s313_s7 = spop %312 }
 0x192   :  { %s315_s10 = spop %314 }
 0x193   :  { %s293_s11 = sadd.f32 %s315_s10, %s313_s7 }
 0x195   :  { %v294_v36 = vstv %s293_s11 }
 0x196   :  { %295 = vst [vmem:[#allocation7] sm:$0xff] %v294_v36 }
 0x197   :  { %378 = shalt.err (!%p375_p6)
}
 0x198   :  { %s379_s15 = scalar_lea.hbm %s495_s2, 128 }
 0x199   :  { %p380_p7 = scmp.ne.s32.totalorder %s495_s2, %s379_s15  ;;  %p383_p8 = scmp.lt.u32.totalorder %s379_s15, %s495_s2 }
 0x19b   :  { %p385_p9 = pnand %p383_p8, %p380_p7 }
 0x19d   :  { %388 = shalt.err (!%p385_p9)
}
 0x19e   :  { %305 = dma.vmem_to_hbm [thread:$0]  %s303_s9, 128, %s495_s2, [#allocation4]  }
 0x19f   :  { %393 = dma.done.wait [#allocation4], 128  }
 0x1a0   :  { %394 = vsyncadd [#allocation4], 4294967168 }
 0x1a1   :  { %309 = vsyncpa [#allocation3], 1 }
 0x1a2   :  { %310 = vsyncpa [#allocation6], 1 }
 0x1a3   :  { %311 = vsyncpa [#allocation4], 1 }

</bundles_post_ra>
